<compile_context>
chip_gen: v7x
topology: tpu7x:2x2x1
jax: 0.10.0
libtpu: 0.0.40
codegen_flags: <defaults>
</compile_context>

<pallas_src>
import jax
import jax.numpy as jnp
from jax.experimental import pallas as pl
from jax.experimental.pallas import tpu as pltpu

IN_F = 784
H1 = 128
H2 = 64
OUT_F = 10
OUT_PAD = 16     # padded logits width: == full output last dim (legal block),
                 # 64 B/sample f32 writeback instead of 512 B with a 128 pad
TB_MAX = 1024    # batch tile: multiple of 8; f32 x double-buffered at 1024 rows
                 # fits every generation's default scoped VMEM with headroom


def _round_up(n, m):
    return ((n + m - 1) // m) * m


def mlp_kernel(x_ref, w1_ref, b1_ref, w2_ref, b2_ref, w3_ref, b3_ref, o_ref):
    # x_ref: (TB, 784) f32 (cast to bf16 in-kernel -> no wrapper cast pass)
    # w1: (784,128) bf16   b1: (1,128) f32
    # w2: (128, 64) bf16   b2: (1, 64) f32
    # w3: (64, 16) bf16 (zero-padded from (64,10))   b3: (1,16) f32 (padded)
    # o : (TB, 16) f32     -- caller slices [:, :10]
    x = x_ref[...].astype(jnp.bfloat16)

    # fc1 + ReLU: bf16 MXU matmul, f32 accumulate; bias/ReLU on VPU in f32.
    h1 = jnp.dot(x, w1_ref[...], preferred_element_type=jnp.float32) + b1_ref[...]
    h1 = jnp.maximum(h1, 0.0).astype(jnp.bfloat16)

    # dropout -> identity (inference / eval mode)

    # fc2 + ReLU
    h2 = jnp.dot(h1, w2_ref[...], preferred_element_type=jnp.float32) + b2_ref[...]
    h2 = jnp.maximum(h2, 0.0).astype(jnp.bfloat16)

    # dropout -> identity (inference / eval mode)

    # fc3 (logits), narrow 16-wide padded output
    o_ref[...] = (
        jnp.dot(h2, w3_ref[...], preferred_element_type=jnp.float32) + b3_ref[...]
    )


def prepare_params(params):
    """One-time prep of PyTorch-shaped params (out_features, in_features):
    transpose to (in, out), zero-pad the final layer to OUT_PAD columns,
    cast weights to bf16 (biases stay f32; accumulation is f32 in-kernel)."""
    w1 = params["w1"].T.astype(jnp.bfloat16)                       # (784, 128)
    w2 = params["w2"].T.astype(jnp.bfloat16)                       # (128, 64)
    w3 = jnp.zeros((H2, OUT_PAD), jnp.bfloat16).at[:, :OUT_F].set(
        params["w3"].T.astype(jnp.bfloat16))                       # (64, 16)
    b1 = params["b1"].reshape(1, -1).astype(jnp.float32)           # (1, 128)
    b2 = params["b2"].reshape(1, -1).astype(jnp.float32)           # (1, 64)
    b3 = jnp.zeros((1, OUT_PAD), jnp.float32).at[:, :OUT_F].set(
        params["b3"].astype(jnp.float32))                          # (1, 16)
    return (w1, b1, w2, b2, w3, b3)


def mnist_net_pallas(x_nchw, prepared):
    """Forward pass of MNISTNet.

    x_nchw   : (B, 1, 28, 28) float32 (PyTorch NCHW convention)
    prepared : output of prepare_params()
    returns  : (B, 10) float32 logits
    """
    w1, b1, w2, b2, w3, b3 = prepared
    B = x_nchw.shape[0]
    x = x_nchw.reshape(B, IN_F)   # free view; stays f32, cast happens in-kernel

    # Batch tile: multiple of 8, <= TB_MAX, and >=2 tiles when B > 8 so the
    # "parallel" batch axis shards across both TensorCores on v7x.
    tb = min(TB_MAX, _round_up(max(-(-B // 2), 8), 8))
    grid = (pl.cdiv(B, tb),)      # ragged last tile; no jnp.pad materialization

    flops = 2 * B * (IN_F * H1 + H1 * H2 + H2 * OUT_PAD)
    bytes_accessed = (
        B * IN_F * 4 + B * OUT_PAD * 4                    # f32 x in, f32 logits out
        + (IN_F * H1 + H1 * H2 + H2 * OUT_PAD) * 2        # bf16 weights
        + (H1 + H2 + OUT_PAD) * 4                         # f32 biases
    )

    # Weights/biases: full-array blocks, same block index every step -> fetched
    # once and VMEM-resident across the batch tiles.
    resident = lambda shape: pl.BlockSpec(shape, lambda i: (0, 0))

    out = pl.pallas_call(
        mlp_kernel,
        out_shape=jax.ShapeDtypeStruct((B, OUT_PAD), jnp.float32),
        grid_spec=pltpu.PrefetchScalarGridSpec(
            num_scalar_prefetch=0,
            grid=grid,
            in_specs=[
                pl.BlockSpec((tb, IN_F), lambda i: (i, 0)),   # x: tiled on batch
                resident(w1.shape), resident(b1.shape),
                resident(w2.shape), resident(b2.shape),
                resident(w3.shape), resident(b3.shape),
            ],
            out_specs=pl.BlockSpec((tb, OUT_PAD), lambda i: (i, 0)),
        ),
        compiler_params=pltpu.CompilerParams(
            dimension_semantics=("parallel",),        # batch tiles across TCs
            vmem_limit_bytes=32 * 1024 * 1024),
        cost_estimate=pl.CostEstimate(
            flops=flops, transcendentals=0, bytes_accessed=bytes_accessed),
    )(x, w1, b1, w2, b2, w3, b3)

    return out[:, :OUT_F]


def init_params(key):
    """Deterministic init with PyTorch nn.Linear shapes (out_features, in_features)."""
    ks = jax.random.split(key, 6)

    def unif(k, shape, fan_in):
        bound = 1.0 / (fan_in ** 0.5)
        return jax.random.uniform(k, shape, jnp.float32, -bound, bound)

    return {
        "w1": unif(ks[0], (128, 784), 784), "b1": unif(ks[1], (128,), 784),
        "w2": unif(ks[2], (64, 128), 128),  "b2": unif(ks[3], (64,), 128),
        "w3": unif(ks[4], (10, 64), 64),    "b3": unif(ks[5], (10,), 64),
    }


def _reference(x_nchw, params):
    B = x_nchw.shape[0]
    xf = x_nchw.reshape(B, IN_F).astype(jnp.float32)
    h1 = jnp.maximum(xf @ params["w1"].T + params["b1"], 0.0)
    h2 = jnp.maximum(h1 @ params["w2"].T + params["b2"], 0.0)
    return h2 @ params["w3"].T + params["b3"]


if __name__ == "__main__":
    key = jax.random.PRNGKey(0)
    k_x, k_x2, k_p = jax.random.split(key, 3)

    params = init_params(k_p)
    prepared = prepare_params(params)   # one-time transpose/pad/cast

    # Small single-tile check.
    B = 8
    x = jax.random.normal(k_x, (B, 1, 28, 28), jnp.float32)  # NCHW like PyTorch
    logits = jax.block_until_ready(mnist_net_pallas(x, prepared))
    assert logits.shape == (B, OUT_F), logits.shape
    ref = _reference(x, params)
    # bf16 inputs/weights with f32 accumulation -> loosened tolerance.
    assert jnp.allclose(logits, ref, atol=5e-2, rtol=5e-2), float(
        jnp.max(jnp.abs(logits - ref)))

    # Two-tile + ragged-last-tile check (tb=16, grid=2, last tile overruns B).
    B2 = 20
    x2 = jax.random.normal(k_x2, (B2, 1, 28, 28), jnp.float32)
    logits2 = jax.block_until_ready(mnist_net_pallas(x2, prepared))
    assert logits2.shape == (B2, OUT_F), logits2.shape
    ref2 = _reference(x2, params)
    assert jnp.allclose(logits2, ref2, atol=5e-2, rtol=5e-2), float(
        jnp.max(jnp.abs(logits2 - ref2)))

    print("KERNEL_OK")
</pallas_src>

<mosaic_0001>
module attributes {stable_mosaic.version = 11 : i64} {
  func.func @mlp_kernel(%arg0: i32, %arg1: memref<8x784xf32, #tpu.memory_space<vmem>>, %arg2: memref<784x128xbf16, #tpu.memory_space<vmem>>, %arg3: memref<1x128xf32, #tpu.memory_space<vmem>>, %arg4: memref<128x64xbf16, #tpu.memory_space<vmem>>, %arg5: memref<1x64xf32, #tpu.memory_space<vmem>>, %arg6: memref<64x16xbf16, #tpu.memory_space<vmem>>, %arg7: memref<1x16xf32, #tpu.memory_space<vmem>>, %arg8: memref<8x16xf32, #tpu.memory_space<vmem>>) attributes {dimension_semantics = [#tpu.dimension_semantics<parallel>], iteration_bounds = array<i64: 1>, scalar_prefetch = 0 : i64, scratch_operands = 0 : i64, tpu.core_type = #tpu.core_type<tc>, window_params = [{transform_indices = @transform_0, window_bounds = array<i64: 8, 784>}, {pipeline_mode = #tpu.pipeline_mode<synchronous>, transform_indices = @transform_1, window_bounds = array<i64: 784, 128>}, {pipeline_mode = #tpu.pipeline_mode<synchronous>, transform_indices = @transform_2, window_bounds = array<i64: 1, 128>}, {pipeline_mode = #tpu.pipeline_mode<synchronous>, transform_indices = @transform_3, window_bounds = array<i64: 128, 64>}, {pipeline_mode = #tpu.pipeline_mode<synchronous>, transform_indices = @transform_4, window_bounds = array<i64: 1, 64>}, {pipeline_mode = #tpu.pipeline_mode<synchronous>, transform_indices = @transform_5, window_bounds = array<i64: 64, 16>}, {pipeline_mode = #tpu.pipeline_mode<synchronous>, transform_indices = @transform_6, window_bounds = array<i64: 1, 16>}, {transform_indices = @transform_7, window_bounds = array<i64: 8, 16>}]} {
    %c0 = arith.constant 0 : index
    %c0_0 = arith.constant 0 : index
    %0 = vector.load %arg1[%c0, %c0_0] : memref<8x784xf32, #tpu.memory_space<vmem>>, vector<8x784xf32>
    %1 = arith.truncf %0 : vector<8x784xf32> to vector<8x784xbf16>
    %c0_1 = arith.constant 0 : index
    %c0_2 = arith.constant 0 : index
    %2 = vector.load %arg2[%c0_1, %c0_2] : memref<784x128xbf16, #tpu.memory_space<vmem>>, vector<784x128xbf16>
    %cst = arith.constant dense<0.000000e+00> : vector<8x128xf32>
    %3 = tpu.matmul %1, %2, %cst {dimension_numbers = #tpu.dot_dimension_numbers<[1], [0], [0], [1], [0, 0, 1, 1], [], []>} : vector<8x784xbf16>, vector<784x128xbf16>, vector<8x128xf32> -> vector<8x128xf32>
    %c0_3 = arith.constant 0 : index
    %c0_4 = arith.constant 0 : index
    %4 = vector.load %arg3[%c0_3, %c0_4] : memref<1x128xf32, #tpu.memory_space<vmem>>, vector<1x128xf32>
    %5 = vector.broadcast %4 : vector<1x128xf32> to vector<8x128xf32>
    %6 = arith.addf %3, %5 : vector<8x128xf32>
    %cst_5 = arith.constant 0.000000e+00 : f32
    %7 = vector.broadcast %cst_5 : f32 to vector<8x128xf32>
    %8 = arith.maximumf %6, %7 : vector<8x128xf32>
    %9 = arith.truncf %8 : vector<8x128xf32> to vector<8x128xbf16>
    %c0_6 = arith.constant 0 : index
    %c0_7 = arith.constant 0 : index
    %10 = vector.load %arg4[%c0_6, %c0_7] : memref<128x64xbf16, #tpu.memory_space<vmem>>, vector<128x64xbf16>
    %cst_8 = arith.constant dense<0.000000e+00> : vector<8x64xf32>
    %11 = tpu.matmul %9, %10, %cst_8 {dimension_numbers = #tpu.dot_dimension_numbers<[1], [0], [0], [1], [0, 0, 1, 1], [], []>} : vector<8x128xbf16>, vector<128x64xbf16>, vector<8x64xf32> -> vector<8x64xf32>
    %c0_9 = arith.constant 0 : index
    %c0_10 = arith.constant 0 : index
    %12 = vector.load %arg5[%c0_9, %c0_10] : memref<1x64xf32, #tpu.memory_space<vmem>>, vector<1x64xf32>
    %13 = vector.broadcast %12 : vector<1x64xf32> to vector<8x64xf32>
    %14 = arith.addf %11, %13 : vector<8x64xf32>
    %cst_11 = arith.constant 0.000000e+00 : f32
    %15 = vector.broadcast %cst_11 : f32 to vector<8x64xf32>
    %16 = arith.maximumf %14, %15 : vector<8x64xf32>
    %17 = arith.truncf %16 : vector<8x64xf32> to vector<8x64xbf16>
    %c0_12 = arith.constant 0 : index
    %c0_13 = arith.constant 0 : index
    %18 = vector.load %arg6[%c0_12, %c0_13] : memref<64x16xbf16, #tpu.memory_space<vmem>>, vector<64x16xbf16>
    %cst_14 = arith.constant dense<0.000000e+00> : vector<8x16xf32>
    %19 = tpu.matmul %17, %18, %cst_14 {dimension_numbers = #tpu.dot_dimension_numbers<[1], [0], [0], [1], [0, 0, 1, 1], [], []>} : vector<8x64xbf16>, vector<64x16xbf16>, vector<8x16xf32> -> vector<8x16xf32>
    %c0_15 = arith.constant 0 : index
    %c0_16 = arith.constant 0 : index
    %20 = vector.load %arg7[%c0_15, %c0_16] : memref<1x16xf32, #tpu.memory_space<vmem>>, vector<1x16xf32>
    %21 = vector.broadcast %20 : vector<1x16xf32> to vector<8x16xf32>
    %22 = arith.addf %19, %21 : vector<8x16xf32>
    %c0_17 = arith.constant 0 : index
    %c0_18 = arith.constant 0 : index
    %23 = vector.load %arg8[%c0_17, %c0_18] : memref<8x16xf32, #tpu.memory_space<vmem>>, vector<8x16xf32>
    tpu.vector_store %arg8[%c0_17, %c0_18], %22 {strides = array<i32>} : memref<8x16xf32, #tpu.memory_space<vmem>>, vector<8x16xf32>,
    return
  }
  func.func @transform_0(%arg0: i32) -> (i32, i32) {
    %c0_i32 = arith.constant 0 : i32
    %c0_i32_0 = arith.constant 0 : i32
    return %arg0, %c0_i32 : i32, i32
  }
  func.func @transform_1(%arg0: i32) -> (i32, i32) {
    %c0_i32 = arith.constant 0 : i32
    %c0_i32_0 = arith.constant 0 : i32
    %c0_i32_1 = arith.constant 0 : i32
    return %c0_i32, %c0_i32_0 : i32, i32
  }
  func.func @transform_2(%arg0: i32) -> (i32, i32) {
    %c0_i32 = arith.constant 0 : i32
    %c0_i32_0 = arith.constant 0 : i32
    %c0_i32_1 = arith.constant 0 : i32
    return %c0_i32, %c0_i32_0 : i32, i32
  }
  func.func @transform_3(%arg0: i32) -> (i32, i32) {
    %c0_i32 = arith.constant 0 : i32
    %c0_i32_0 = arith.constant 0 : i32
    %c0_i32_1 = arith.constant 0 : i32
    return %c0_i32, %c0_i32_0 : i32, i32
  }
  func.func @transform_4(%arg0: i32) -> (i32, i32) {
    %c0_i32 = arith.constant 0 : i32
    %c0_i32_0 = arith.constant 0 : i32
    %c0_i32_1 = arith.constant 0 : i32
    return %c0_i32, %c0_i32_0 : i32, i32
  }
  func.func @transform_5(%arg0: i32) -> (i32, i32) {
    %c0_i32 = arith.constant 0 : i32
    %c0_i32_0 = arith.constant 0 : i32
    %c0_i32_1 = arith.constant 0 : i32
    return %c0_i32, %c0_i32_0 : i32, i32
  }
  func.func @transform_6(%arg0: i32) -> (i32, i32) {
    %c0_i32 = arith.constant 0 : i32
    %c0_i32_0 = arith.constant 0 : i32
    %c0_i32_1 = arith.constant 0 : i32
    return %c0_i32, %c0_i32_0 : i32, i32
  }
  func.func @transform_7(%arg0: i32) -> (i32, i32) {
    %c0_i32 = arith.constant 0 : i32
    %c0_i32_0 = arith.constant 0 : i32
    return %arg0, %c0_i32 : i32, i32
  }
}

</mosaic_0001>

<bundles_post_ra>
// kernel: tpu_custom_call.1
= control target key start
LH: loop header
LB: loop body
LE: loop exit
PB: predicated region body
PF: predicated region fallthrough
CT: control target
= control target key end

     0   :  { %12 = vsyncpa [#allocation3], 0  ;;  %s1291_s0 = inlined_call_operand.vmem [shape: f32[8,784], index: 0, kind: input, shape index: {}]   ;;  %s1292_s1 = inlined_call_operand.hbm [shape: bf16[784,128], index: 1, kind: input, shape index: {}]   ;;  %s1293_s2 = inlined_call_operand.vmem [shape: f32[1,128], index: 2, kind: input, shape index: {}]   ;;  %s1294_s3 = inlined_call_operand.vmem [shape: bf16[128,64], index: 3, kind: input, shape index: {}]   ;;  %s1295_s4 = inlined_call_operand.vmem [shape: f32[1,64], index: 4, kind: input, shape index: {}]   ;;  %s1296_s5 = inlined_call_operand.vmem [shape: bf16[64,16], index: 5, kind: input, shape index: {}]   ;;  %s1297_s6 = inlined_call_operand.vmem [shape: f32[1,16], index: 6, kind: input, shape index: {}]   ;;  %s1298_s7 = inlined_call_operand.hbm [shape: f32[8,16], index: 7, kind: output, shape index: {}]  }
   0x1   :  { %13 = vsyncpa [#allocation4], 0  ;;  %s1134_s24 = smov [#allocation2]   ;;  %s1086_s28 = scalar_lea.hbm %s1292_s1, 6272 }
   0x2   :  { %s21_s25 = sshll.u32 %s1134_s24, 4  ;;  %p1087_p0 = scmp.ne.s32.totalorder %s1292_s1, %s1086_s28  ;;  %s22_s25 = int_to_ptr.vmem [resolvable:$true] %s21_s25 }
   0x3   :  { %p1090_p1 = scmp.lt.u32.totalorder %s1086_s28, %s1292_s1 }
   0x5   :  { %p1092_p2 = pnand %p1090_p1, %p1087_p0 }
   0x7   :  { %1095 = shalt.err (!%p1092_p2)
}
   0x8   :  { %s1096_s10 = scalar_lea.vmem %s22_s25, 6272  ;;  %p1101_p4 = scmp.lt.s32.totalorder %s22_s25, %s22_s25 }
   0x9   :  { %p1097_p3 = scmp.ne.s32.totalorder %s22_s25, %s1096_s10  ;;  %p1102_p5 = scmp.lt.s32.totalorder %s1096_s10, %s1096_s10 }
   0xb   :  { %p1103_p6 = por %p1102_p5, %p1101_p4 }
   0xd   :  { %p1104_p7 = pnand %p1103_p6, %p1097_p3 }
   0xf   :  { %1107 = shalt.err (!%p1104_p7)
}
  0x10   :  { %s1135_s11 = smov 64   ;;  %s1136_s12 = smov 4  }
  0x11   :  { %27 = dma.hbm_to_vmem [thread:$0]  %s1292_s1, 6272, %s22_s25, [#allocation3], %s1135_s11, %s1135_s11, %s1136_s12  }
  0x12   :  { %1130 = dma.done.wait [#allocation3], 6272  }
  0x13   :  { %1131 = vsyncadd [#allocation3], 4294961024  ;;  %v1025_v0 = vld [vmem:[#allocation2 + $0x40] sm:$0xff]   ;;  %v1029_v4 = vld [vmem:[#allocation2 + $0x48] sm:$0xff]   ;;  %v1137_v44 = vmov 0.0   ;;  %vm1138_vm0 = vmmov 0  }
  0x14   :  { %v1026_v1 = vld [vmem:[#allocation2] sm:$0xff]   ;;  %899 = vmatprep.subr.bf16.mxu0 %v1025_v0  ;;  %v1030_v5 = vld [vmem:[#allocation2 + $0x8] sm:$0xff]   ;;  %v1033_v8 = vld [vmem:[#allocation2 + $0x50] sm:$0xff]   ;;  %vm455_vm1 = vcmask 130048   ;;  %vm773_vm2 = vcmask 523264   ;;  %s1139_s8 = smov [#allocation5]  }
  0x15   :  { %v1027_v2 = vld [vmem:[#allocation2 + $0xc0] sm:$0xff]   ;;  %900 = vmatpush3.bf16.msra.mxu0 %v1026_v1  ;;  %v1031_v6 = vld [vmem:[#allocation2 + $0xc8] sm:$0xff]   ;;  %v1034_v9 = vld [vmem:[#allocation2 + $0x10] sm:$0xff]  }
  0x16   :  { %v1028_v3 = vld [vmem:[#allocation2 + $0x80] sm:$0xff]   ;;  %921 = vmatprep.subr.bf16.mxu1 %v1027_v2  ;;  %901 = vmatprep.subr.bf16.mxu0 %v1029_v4  ;;  %v1032_v7 = vld [vmem:[#allocation2 + $0x88] sm:$0xff]   ;;  %v1035_v10 = vld [vmem:[#allocation2 + $0xd0] sm:$0xff]  }
  0x17   :  { %922 = vmatpush3.bf16.msra.mxu1 %v1028_v3  ;;  %v1036_v11 = vld [vmem:[#allocation2 + $0x90] sm:$0xff]   ;;  %v1037_v12 = vld [vmem:[#allocation2 + $0x58] sm:$0xff]   ;;  %v1041_v16 = vld [vmem:[#allocation2 + $0x60] sm:$0xff]  }
  0x18   :  { %923 = vmatprep.subr.bf16.mxu1 %v1031_v6  ;;  %v1038_v13 = vld [vmem:[#allocation2 + $0x18] sm:$0xff]   ;;  %v1042_v17 = vld [vmem:[#allocation2 + $0x20] sm:$0xff]   ;;  %v1045_v20 = vld [vmem:[#allocation2 + $0x68] sm:$0xff]  }
  0x19   :  { %902 = vmatpush3.bf16.msra.mxu0 %v1030_v5  ;;  %v1039_v14 = vld [vmem:[#allocation2 + $0xd8] sm:$0xff]   ;;  %v1043_v18 = vld [vmem:[#allocation2 + $0xe0] sm:$0xff]   ;;  %v1046_v21 = vld [vmem:[#allocation2 + $0x28] sm:$0xff]  }
  0x1a   :  { %903 = vmatprep.subr.bf16.mxu0 %v1033_v8  ;;  %v1040_v15 = vld [vmem:[#allocation2 + $0x98] sm:$0xff]   ;;  %v1044_v19 = vld [vmem:[#allocation2 + $0xa0] sm:$0xff]   ;;  %v1047_v22 = vld [vmem:[#allocation2 + $0xe8] sm:$0xff]  }
  0x1b   :  { %924 = vmatpush3.bf16.msra.mxu1 %v1032_v7  ;;  %v1048_v23 = vld [vmem:[#allocation2 + $0xa8] sm:$0xff]   ;;  %v1049_v24 = vld [vmem:[#allocation2 + $0x70] sm:$0xff]   ;;  %v1053_v28 = vld [vmem:[#allocation2 + $0x78] sm:$0xff]  }
  0x1c   :  { %925 = vmatprep.subr.bf16.mxu1 %v1035_v10  ;;  %v1050_v25 = vld [vmem:[#allocation2 + $0x30] sm:$0xff]   ;;  %v1054_v29 = vld [vmem:[#allocation2 + $0x38] sm:$0xff]   ;;  %v43_v31 = vld [vmem:[%s1291_s0 + $0x8] sm:$0xff] }
  0x1d   :  { %904 = vmatpush3.bf16.msra.mxu0 %v1034_v9  ;;  %v1051_v26 = vld [vmem:[#allocation2 + $0xf0] sm:$0xff]   ;;  %v1055_v30 = vld [vmem:[#allocation2 + $0xf8] sm:$0xff]   ;;  %v50_v32 = vpack.c.bf16 %v43_v31, %v43_v31  ;;  %v42_v34 = vld [vmem:[%s1291_s0] sm:$0xff] }
  0x1e   :  { %905 = vmatprep.subr.bf16.mxu0 %v1037_v12  ;;  %v1052_v27 = vld [vmem:[#allocation2 + $0xb0] sm:$0xff]   ;;  %v1056_v33 = vld [vmem:[#allocation2 + $0xb8] sm:$0xff]   ;;  %v49_v35 = vpack.c.bf16 %v42_v34, %v42_v34  ;;  %v1057_v36 = vld [vmem:[#allocation2 + $0x140] sm:$0xff]  }
  0x1f   :  { %926 = vmatpush3.bf16.msra.mxu1 %v1036_v11  ;;  %v45_v37 = vld [vmem:[%s1291_s0 + $0x18] sm:$0xff]  ;;  %491 = vmatprep.mubr.bf16.mxu0 %v50_v32  ;;  %v1058_v39 = vld [vmem:[#allocation2 + $0x100] sm:$0xff]   ;;  %v44_v40 = vld [vmem:[%s1291_s0 + $0x10] sm:$0xff] }
  0x20   :  { %927 = vmatprep.subr.bf16.mxu1 %v1039_v14  ;;  %v52_v38 = vpack.c.bf16 %v45_v37, %v45_v37  ;;  %v51_v41 = vpack.c.bf16 %v44_v40, %v44_v40  ;;  %v1059_v42 = vld [vmem:[#allocation2 + $0x148] sm:$0xff]   ;;  %v1061_v45 = vld [vmem:[#allocation2 + $0x150] sm:$0xff]   ;;  %v1063_v47 = vld [vmem:[#allocation2 + $0x158] sm:$0xff]  }
  0x21   :  { %906 = vmatpush3.bf16.msra.mxu0 %v1038_v13  ;;  %v1060_v43 = vld [vmem:[#allocation2 + $0x108] sm:$0xff]   ;;  %v1062_v46 = vld [vmem:[#allocation2 + $0x110] sm:$0xff]   ;;  %v1064_v48 = vld [vmem:[#allocation2 + $0x118] sm:$0xff]  }
  0x22   :  { %907 = vmatprep.subr.bf16.mxu0 %v1041_v16  ;;  %531 = vmatprep.mubr.bf16.mxu1 %v52_v38  ;;  %v1065_v49 = vld [vmem:[#allocation2 + $0x160] sm:$0xff]   ;;  %v1067_v51 = vld [vmem:[#allocation2 + $0x168] sm:$0xff]   ;;  %v1069_v55 = vld [vmem:[#allocation2 + $0x170] sm:$0xff]  }
  0x23   :  { %928 = vmatpush3.bf16.msra.mxu1 %v1040_v15  ;;  %v1066_v50 = vld [vmem:[#allocation2 + $0x120] sm:$0xff]   ;;  %v1068_v52 = vld [vmem:[#allocation2 + $0x128] sm:$0xff]   ;;  %v48_v57 = vld [vmem:[%s1291_s0 + $0x30] sm:$0xff] }
  0x24   :  { %929 = vmatprep.subr.bf16.mxu1 %v1043_v18  ;;  %v1073_v53 = vld [vmem:[#allocation2 + $0x180] sm:$0xff]   ;;  %v47_v54 = vld [vmem:[%s1291_s0 + $0x28] sm:$0xff]  ;;  %v55_v58 = vpack.c.bf16 %v48_v57, %v48_v57  ;;  %v1070_v59 = vld [vmem:[#allocation2 + $0x130] sm:$0xff]  }
  0x25   :  { %908 = vmatpush3.bf16.msra.mxu0 %v1042_v17  ;;  %v54_v56 = vpack.c.bf16 %v47_v54, %v47_v54  ;;  %v1071_v60 = vld [vmem:[#allocation2 + $0x178] sm:$0xff]   ;;  %v46_v62 = vld [vmem:[%s1291_s0 + $0x20] sm:$0xff]  ;;  %v1075_v1 = vld [vmem:[%s1294_s3 + $0x8] sm:$0xff]  }
  0x26   :  { %909 = vmatprep.subr.bf16.mxu0 %v1045_v20  ;;  %v1072_v61 = vld [vmem:[#allocation2 + $0x138] sm:$0xff]   ;;  %v53_v63 = vpack.c.bf16 %v46_v62, %v46_v62  ;;  %v1074_v0 = vld [vmem:[%s1294_s3] sm:$0xff]   ;;  %v1076_v2 = vld [vmem:[%s1294_s3 + $0x10] sm:$0xff]  }
  0x27   :  { %930 = vmatpush3.bf16.msra.mxu1 %v1044_v19  ;;  %v1077_v3 = vld [vmem:[%s1294_s3 + $0x18] sm:$0xff]   ;;  %v1078_v4 = vld [vmem:[%s1294_s3 + $0x20] sm:$0xff]   ;;  %v1079_v5 = vld [vmem:[%s1294_s3 + $0x28] sm:$0xff]  }
  0x28   :  { %931 = vmatprep.subr.bf16.mxu1 %v1047_v22  ;;  %v1080_v6 = vld [vmem:[%s1294_s3 + $0x30] sm:$0xff]   ;;  %v1081_v7 = vld [vmem:[%s1294_s3 + $0x38] sm:$0xff]   ;;  %v1082_v8 = vld [vmem:[%s1296_s5] sm:$0xff]  }
  0x29   :  { %910 = vmatpush3.bf16.msra.mxu0 %v1046_v21  ;;  %v1083_v9 = vld [vmem:[%s1296_s5 + $0x8] sm:$0xff]   ;;  %v833_v11 = vld [vmem:[%s1293_s2] ss:$0 sm:$0xff]  ;;  %v1085_v37 = vld [vmem:[%s1296_s5 + $0x18] sm:$0xff]  }
  0x2a   :  { %911 = vmatprep.subr.bf16.mxu0 %v1049_v24  ;;  %v884_v38 = vld [vmem:[%s1295_s4] ss:$0 sm:$0xff] }
  0x2b   :  { %932 = vmatpush3.bf16.msra.mxu1 %v1048_v23 }
  0x2c   :  { %933 = vmatprep.subr.bf16.mxu1 %v1051_v26 }
  0x2d   :  { %912 = vmatpush3.bf16.msra.mxu0 %v1050_v25 }
  0x2e   :  { %913 = vmatprep.subr.bf16.mxu0 %v1053_v28 }
  0x2f   :  { %934 = vmatpush3.bf16.msra.mxu1 %v1052_v27 }
  0x30   :  { %935 = vmatprep.subr.bf16.mxu1 %v1055_v30 }
  0x31   :  { %914 = vmatpush3.bf16.msra.mxu0 %v1054_v29 }
  0x32   :  { %943 = vmatprep.subr.bf16.mxu0 %v1057_v36  ;;  %v1084_v36 = vld [vmem:[%s1296_s5 + $0x10] sm:$0xff]   ;;  %s824_s5 = sshll.u32 %s1139_s8, 4  ;;  %s825_s5 = int_to_ptr.vmem [resolvable:$true] %s824_s5 }
  0x33   :  { %936 = vmatpush3.bf16.msra.mxu1 %v1056_v33  ;;  %s1108_s4 = scalar_lea.vmem %s825_s5, 128  ;;  %p1113_p9 = scmp.lt.s32.totalorder %s825_s5, %s825_s5 }
  0x34   :  { %492 = vmatmul.mubr.bf16.vlgmr.msra.gmra.mrb[0].mxu0 %v49_v35  ;;  %981 = vmatprep.subr.bf16.mxu1 %v1137_v44  ;;  %p1109_p8 = scmp.ne.s32.totalorder %s825_s5, %s1108_s4  ;;  %p1114_p10 = scmp.lt.s32.totalorder %s1108_s4, %s1108_s4 }
  0x35   :  { %944 = vmatpush3.bf16.msra.mxu0 %v1058_v39  ;;  %571 = vmatprep.mubr.bf16.mxu0 %v54_v56 }
  0x36   :  { %532 = vmatmul.mubr.bf16.vlgmr.msra.gmra.mrb[0].mxu1 %v51_v41  ;;  %945 = vmatprep.subr.bf16.mxu0 %v1059_v42  ;;  %p1115_p11 = por %p1114_p10, %p1113_p9 }
  0x37   :  { %983 = vmatprep.mubr.msk.bf16.mxu1 %vm1138_vm0, %v1137_v44  ;;  %982 = vmatpush3.bf16.msra.mxu1 %v1073_v53 }
  0x38   :  { %987 = vmatprep.subr.bf16.mxu1 %v1137_v44  ;;  %p1116_p12 = pnand %p1115_p11, %p1109_p8 }
  0x39   :  { %946 = vmatpush3.bf16.msra.mxu0 %v1060_v43 }
  0x3a   :  { %947 = vmatprep.subr.bf16.mxu0 %v1061_v45 }
  0x3d   :  { %948 = vmatpush3.bf16.msra.mxu0 %v1062_v46 }
  0x3e   :  { %949 = vmatprep.subr.bf16.mxu0 %v1063_v47  ;;  %984 = vmatmul.mubr.msk.bf16.vlgmr.msra.gmra.mrb[4].mxu1 %vm455_vm1, %v55_v58 }
  0x3f   :  { %1003 = vmatprep.mubr.msk.bf16.mxu1 %vm1138_vm0, %v1137_v44  ;;  %988 = vmatpush3.bf16.msra.mxu1 %v1074_v0 }
  0x40   :  { %989 = vmatprep.subr.bf16.mxu1 %v1137_v44 }
  0x41   :  { %950 = vmatpush3.bf16.msra.mxu0 %v1064_v48 }
  0x42   :  { %951 = vmatprep.subr.bf16.mxu0 %v1065_v49 }
  0x43   :  { %990 = vmatpush3.bf16.msra.mxu1 %v1075_v1 }
  0x44   :  { %991 = vmatprep.subr.bf16.mxu1 %v1137_v44 }
  0x45   :  { %952 = vmatpush3.bf16.msra.mxu0 %v1066_v50 }
  0x46   :  { %953 = vmatprep.subr.bf16.mxu0 %v1067_v51 }
  0x47   :  { %992 = vmatpush3.bf16.msra.mxu1 %v1076_v2 }
  0x48   :  { %993 = vmatprep.subr.bf16.mxu1 %v1137_v44 }
  0x49   :  { %954 = vmatpush3.bf16.msra.mxu0 %v1068_v52 }
  0x4a   :  { %955 = vmatprep.subr.bf16.mxu0 %v1069_v55 }
  0x4b   :  { %994 = vmatpush3.bf16.msra.mxu1 %v1077_v3 }
  0x4c   :  { %995 = vmatprep.subr.bf16.mxu1 %v1137_v44 }
  0x4d   :  { %956 = vmatpush3.bf16.msra.mxu0 %v1070_v59 }
  0x4e   :  { %957 = vmatprep.subr.bf16.mxu0 %v1071_v60 }
  0x4f   :  { %996 = vmatpush3.bf16.msra.mxu1 %v1078_v4 }
  0x50   :  { %997 = vmatprep.subr.bf16.mxu1 %v1137_v44 }
  0x51   :  { %958 = vmatpush3.bf16.msra.mxu0 %v1072_v61 }
  0x52   :  { %1007 = vmatprep.subr.bf16.mxu0 %v1137_v44 }
  0x53   :  { %998 = vmatpush3.bf16.msra.mxu1 %v1079_v5 }
  0x54   :  { %572 = vmatmul.mubr.bf16.vlgmr.msra.gmra.mrb[4].mxu0 %v53_v63  ;;  %999 = vmatprep.subr.bf16.mxu1 %v1137_v44 }
  0x55   :  { %1015 = vmatprep.mubr.msk.bf16.mxu0 %vm1138_vm0, %v1137_v44  ;;  %1008 = vmatpush3.bf16.msra.mxu0 %v1082_v8 }
  0x56   :  { %1009 = vmatprep.subr.bf16.mxu0 %v1137_v44 }
  0x57   :  { %1000 = vmatpush3.bf16.msra.mxu1 %v1080_v6 }
  0x58   :  { %1001 = vmatprep.subr.bf16.mxu1 %v1137_v44 }
  0x59   :  { %1010 = vmatpush3.bf16.msra.mxu0 %v1083_v9 }
  0x5a   :  { %1011 = vmatprep.subr.bf16.mxu0 %v1137_v44 }
  0x5b   :  { %1002 = vmatpush3.bf16.msra.mxu1 %v1081_v7 }
  0x5d   :  { %1012 = vmatpush3.bf16.msra.mxu0 %v1084_v36 }
  0x5e   :  { %1013 = vmatprep.subr.bf16.mxu0 %v1137_v44  ;;  %v893_v44 = vld [vmem:[%s1297_s6] ss:$0 sm:$0xff] }
  0x61   :  { %1014 = vmatpush3.bf16.msra.mxu0 %v1085_v37 }
 0x107   :  { %v915_v10 = vpop.f32.mrb[0].mxu0 }
 0x108   :  { %v916_v12 = vpop.f32.mrb[1].mxu0 }
 0x109   :  { %v917_v13 = vadd.f32 %v916_v12, %v915_v10  ;;  %v918_v14 = vpop.f32.mrb[2].mxu0  ;;  %v937_v15 = vpop.f32.mrb[0].mxu1 }
 0x10a   :  { %v919_v16 = vpop.f32.mrb[3].mxu0  ;;  %v938_v18 = vpop.f32.mrb[1].mxu1 }
 0x10b   :  { %v494_v17 = vadd.f32 %v917_v13, %v833_v11  ;;  %v939_v19 = vadd.f32 %v938_v18, %v937_v15  ;;  %v940_v20 = vpop.f32.mrb[2].mxu1 }
 0x10c   :  { %v941_v21 = vpop.f32.mrb[3].mxu1 }
 0x10d   :  { %v534_v22 = vadd.f32 %v939_v19, %v494_v17 }
 0x111   :  { %v613_v23 = vpop.f32.mrb[4].mxu1 }
 0x112   :  { %v985_v24 = vpop.f32.mrb[5].mxu1 }
 0x113   :  { %v616_v25 = vpop.f32.mrb[6].mxu1 }
 0x114   :  { %v986_v26 = vpop.f32.mrb[7].mxu1 }
 0x127   :  { %v959_v27 = vpop.f32.mrb[4].mxu0 }
 0x128   :  { %v960_v28 = vpop.f32.mrb[5].mxu0 }
 0x129   :  { %v961_v29 = vadd.f32 %v960_v28, %v959_v27  ;;  %v962_v30 = vpop.f32.mrb[6].mxu0 }
 0x12a   :  { %v963_v31 = vpop.f32.mrb[7].mxu0 }
 0x12b   :  { %v574_v32 = vadd.f32 %v961_v29, %v534_v22 }
 0x12d   :  { %v614_v33 = vadd.f32 %v613_v23, %v574_v32 }
 0x12f   :  { %v619_v34 = vmax.f32 %v614_v33, 0.0 }
 0x131   :  { %v620_v35 = vpack.c.bf16 %v619_v34, %v619_v34 }
 0x133   :  { %1004 = vmatmul.mubr.bf16.vlgmr.msra.gmra.mrb[8].mxu1 %v620_v35 }
 0x206   :  { %v726_v39 = vpop.f32.mrb[8].mxu1 }
 0x207   :  { %v727_v40 = vadd.f32 %v884_v38, %v726_v39  ;;  %v1005_v41 = vpop.f32.mrb[9].mxu1 }
 0x208   :  { %v729_v42 = vpop.f32.mrb[10].mxu1 }
 0x209   :  { %v732_v43 = vmax.f32 %v727_v40, 0.0  ;;  %v1006_v45 = vpop.f32.mrb[11].mxu1 }
 0x20b   :  { %v733_v46 = vpack.c.bf16 %v732_v43, %v732_v43 }
 0x20d   :  { %1016 = vmatmul.mubr.msk.bf16.vlgmr.msra.gmra.mrb[8].mxu0 %vm773_vm2, %v733_v46 }
 0x2e0   :  { %v811_v47 = vpop.f32.mrb[8].mxu0 }
 0x2e1   :  { %v812_v48 = vadd.f32 %v893_v44, %v811_v47  ;;  %v1017_v49 = vpop.f32.mrb[9].mxu0 }
 0x2e2   :  { %v814_v50 = vpop.f32.mrb[10].mxu0 }
 0x2e3   :  { %817 = vst.msk [vmem:[#allocation5] sm:$0xff] %vm455_vm1, %v812_v48  ;;  %v1018_v51 = vpop.f32.mrb[11].mxu0 }
 0x2e4   :  { %1119 = shalt.err (!%p1116_p12)
}
 0x2e5   :  { %s1120_s6 = scalar_lea.hbm %s1298_s7, 128 }
 0x2e6   :  { %p1121_p13 = scmp.ne.s32.totalorder %s1298_s7, %s1120_s6  ;;  %p1124_p0 = scmp.lt.u32.totalorder %s1120_s6, %s1298_s7 }
 0x2e8   :  { %p1126_p1 = pnand %p1124_p0, %p1121_p13 }
 0x2ea   :  { %1129 = shalt.err (!%p1126_p1)
}
 0x2eb   :  { %827 = dma.vmem_to_hbm [thread:$0]  %s825_s5, 128, %s1298_s7, [#allocation4]  }
 0x2ec   :  { %1132 = dma.done.wait [#allocation4], 128  }
 0x2ed   :  { %1133 = vsyncadd [#allocation4], 4294967168 }
 0x2ee   :  { %831 = vsyncpa [#allocation3], 1 }
 0x2ef   :  { %832 = vsyncpa [#allocation4], 1 }

</bundles_post_ra>
